<compile_context>
chip_gen: v6e
topology: v6e:2x2x1
jax: 0.10.0
libtpu: 0.0.40
codegen_flags: <defaults>
</compile_context>

<pallas_src>
import functools

import jax
import jax.numpy as jnp
from jax.experimental import pallas as pl
from jax.experimental.pallas import tpu as pltpu

TM_CAP = 512            # max matmul row tile
TN_CAP = 256            # max matmul col tile (256-wide MXU on v6e/v7x)
POOL_TM_CAP = 1024      # max maxpool row tile
MIB = 1024 * 1024


# ----------------------------------------------------------------------------
# Pallas kernels
# ----------------------------------------------------------------------------
def _mm_bn_kernel(x_ref, w_ref, s_ref, b_ref, *rest, apply_relu, has_residual):
    """(TM, K)bf16 @ (K, TN)bf16 on the MXU -> f32 accum, then folded-BN
    scale/bias, optional fused residual add (bf16 in) and optional ReLU."""
    if has_residual:
        res_ref, o_ref = rest
    else:
        (o_ref,) = rest
    acc = jnp.dot(x_ref[...], w_ref[...], preferred_element_type=jnp.float32)
    y = acc * s_ref[...] + b_ref[...]
    if has_residual:
        y = y + res_ref[...].astype(jnp.float32)
    if apply_relu:
        y = jnp.maximum(y, 0.0)
    o_ref[...] = y.astype(o_ref.dtype)


def _maxpool_kernel(*refs):
    """Element-wise max over 9 shifted-window taps; blocks are lane-dense."""
    o_ref = refs[-1]
    acc = refs[0][...]
    for r in refs[1:-1]:
        acc = jnp.maximum(acc, r[...])
    o_ref[...] = acc


# ----------------------------------------------------------------------------
# Tiling helpers
# ----------------------------------------------------------------------------
def _round_up(x, m):
    return (x + m - 1) // m * m


# ----------------------------------------------------------------------------
# Fused matmul + BN(+residual)(+ReLU) wrapper
# ----------------------------------------------------------------------------
def matmul_scale_bias(x, w, scale, bias, *, apply_relu, residual=None,
                      out_dtype=jnp.bfloat16):
    """y = maybe_relu((x @ w) * scale + bias [+ residual]).

    x: (M, K) -> bf16; w: (K, N) bf16 (pre-transformed at init);
    scale/bias per output column (f32); residual optional (M, N), cast bf16.
    Output dtype bf16 by default (activations stay bf16 between layers).
    """
    M, K = x.shape
    Kw, N = w.shape
    assert K == Kw

    # Row tiling: big tiles, pad M up instead of searching for small divisors.
    tm = min(_round_up(M, 8), TM_CAP)
    Mp = _round_up(M, tm)
    # Col tiling: full-N block when it fits, else 256-wide tiles.
    if N <= TN_CAP:
        tn, Np = N, N
    else:
        tn, Np = TN_CAP, _round_up(N, TN_CAP)

    xp = x.astype(jnp.bfloat16)
    if Mp != M:
        xp = jnp.pad(xp, ((0, Mp - M), (0, 0)))
    wp = w.astype(jnp.bfloat16)
    if Np != N:
        wp = jnp.pad(wp, ((0, 0), (0, Np - N)))
    sp = scale.reshape(1, -1).astype(jnp.float32)
    bp = bias.reshape(1, -1).astype(jnp.float32)
    if Np != N:
        sp = jnp.pad(sp, ((0, 0), (0, Np - N)))
        bp = jnp.pad(bp, ((0, 0), (0, Np - N)))

    has_res = residual is not None
    if has_res:
        rp = residual.astype(jnp.bfloat16)
        if Mp != M or Np != N:
            rp = jnp.pad(rp, ((0, Mp - M), (0, Np - N)))

    n_row, n_col = Mp // tm, Np // tn

    # Choose grid order so the inner sweep reuses the larger operand:
    #   i-outer: weights re-streamed n_row times; j-outer: x re-streamed n_col
    # times.  Small-M deep layers pick j-outer -> single-pass weight residency.
    weight_restream = (n_row - 1) * K * Np
    act_restream = (n_col - 1) * Mp * K
    n_outer = act_restream < weight_restream

    if n_outer:
        grid = (n_col, n_row)
        x_map = lambda j, i: (i, 0)
        w_map = lambda j, i: (0, j)
        v_map = lambda j, i: (0, j)
        o_map = lambda j, i: (i, j)
    else:
        grid = (n_row, n_col)
        x_map = lambda i, j: (i, 0)
        w_map = lambda i, j: (0, j)
        v_map = lambda i, j: (0, j)
        o_map = lambda i, j: (i, j)

    in_specs = [
        pl.BlockSpec((tm, K), x_map),
        pl.BlockSpec((K, tn), w_map),
        pl.BlockSpec((1, tn), v_map),
        pl.BlockSpec((1, tn), v_map),
    ]
    inputs = [xp, wp, sp, bp]
    if has_res:
        inputs.append(rp)
        in_specs.append(pl.BlockSpec((tm, tn), o_map))

    out_bytes = jnp.dtype(out_dtype).itemsize
    # Double-buffered per-call footprint -> explicit scoped-VMEM budget
    # (capped at 48 MiB so it also fits v7x's 64 MiB with headroom).
    footprint = 2 * (tm * K * 2 + K * tn * 2 + tm * tn * out_bytes
                     + (tm * tn * 2 if has_res else 0) + 2 * tn * 4)
    vmem_limit = int(min(max(footprint + 16 * MIB, 24 * MIB), 48 * MIB))

    flops = 2 * Mp * Np * K
    bytes_accessed = (Mp * K * 2 + K * Np * 2 + Mp * Np * out_bytes
                      + (Mp * Np * 2 if has_res else 0) + 2 * Np * 4)

    out = pl.pallas_call(
        functools.partial(_mm_bn_kernel, apply_relu=apply_relu,
                          has_residual=has_res),
        out_shape=jax.ShapeDtypeStruct((Mp, Np), out_dtype),
        grid_spec=pltpu.PrefetchScalarGridSpec(
            num_scalar_prefetch=0,
            grid=grid,
            in_specs=in_specs,
            out_specs=pl.BlockSpec((tm, tn), o_map),
        ),
        compiler_params=pltpu.CompilerParams(
            dimension_semantics=("parallel", "parallel"),
            vmem_limit_bytes=vmem_limit),
        cost_estimate=pl.CostEstimate(flops=flops, transcendentals=0,
                                      bytes_accessed=bytes_accessed),
    )(*inputs)
    if Mp != M or Np != N:
        out = out[:M, :N]
    return out


# ----------------------------------------------------------------------------
# Conv / pool wrappers
# ----------------------------------------------------------------------------
def extract_patches(x, kh, kw, stride, pad, pad_value=0.0):
    """im2col glue (bf16). x: (N, H, W, C) -> (N, oh, ow, kh*kw, C)."""
    x = jnp.pad(x, ((0, 0), (pad, pad), (pad, pad), (0, 0)),
                constant_values=pad_value)
    N, H, W, C = x.shape
    oh = (H - kh) // stride + 1
    ow = (W - kw) // stride + 1
    cols = []
    for i in range(kh):
        for j in range(kw):
            cols.append(x[:, i:i + stride * (oh - 1) + 1:stride,
                          j:j + stride * (ow - 1) + 1:stride, :])
    p = jnp.stack(cols, axis=3)  # (N, oh, ow, kh*kw, C)
    return p, (N, oh, ow, C)


def conv_bn(x, wm, scale, bias, *, kh, kw, stride, pad, relu, residual=None):
    """Conv2d (no conv bias) with folded BN via fused Pallas matmul.

    x: (N, H, W, Cin); wm: (kh*kw*Cin, Cout) bf16 (pre-transformed at init);
    residual (optional): (N, oh, ow, Cout), fused into the epilogue.
    Output is bf16 NHWC.
    """
    N, H, W, Cin = x.shape
    K, Cout = wm.shape
    # bf16 BEFORE im2col: the 9x-inflated patch tensor moves at half the bytes.
    x = x.astype(jnp.bfloat16)
    p, (_, oh, ow, _) = extract_patches(x, kh, kw, stride, pad)
    pm = p.reshape(N * oh * ow, kh * kw * Cin)
    res2d = None
    if residual is not None:
        res2d = residual.reshape(N * oh * ow, Cout)
    y = matmul_scale_bias(pm, wm, scale, bias, apply_relu=relu, residual=res2d)
    return y.reshape(N, oh, ow, Cout)


def maxpool2d(x, k=3, stride=2, pad=1):
    """MaxPool2d(kernel=3, stride=2, padding=1) as a lane-dense Pallas max."""
    N, H, W, C = x.shape
    dtype = x.dtype
    xp = jnp.pad(x, ((0, 0), (pad, pad), (pad, pad), (0, 0)),
                 constant_values=-jnp.inf)
    Hp, Wp = H + 2 * pad, W + 2 * pad
    oh = (Hp - k) // stride + 1
    ow = (Wp - k) // stride + 1
    M = N * oh * ow

    # Max is elementwise, so (M, C) and (M*C/128, 128) views are equivalent.
    # Lane-dense view avoids masked partial stores for C=64.
    if (M * C) % 128 == 0 and C <= 128:
        rows, cols = (M * C) // 128, 128
    else:
        rows, cols = M, C

    taps = []
    for i in range(k):
        for j in range(k):
            t = xp[:, i:i + stride * (oh - 1) + 1:stride,
                   j:j + stride * (ow - 1) + 1:stride, :]
            taps.append(t.reshape(rows, cols))

    tm = min(_round_up(rows, 8), POOL_TM_CAP)
    Mp = _round_up(rows, tm)
    if Mp != rows:
        taps = [jnp.pad(t, ((0, Mp - rows), (0, 0))) for t in taps]

    out = pl.pallas_call(
        _maxpool_kernel,
        out_shape=jax.ShapeDtypeStruct((Mp, cols), dtype),
        grid_spec=pltpu.PrefetchScalarGridSpec(
            num_scalar_prefetch=0,
            grid=(Mp // tm,),
            in_specs=[pl.BlockSpec((tm, cols), lambda i: (i, 0))
                      for _ in range(k * k)],
            out_specs=pl.BlockSpec((tm, cols), lambda i: (i, 0)),
        ),
        compiler_params=pltpu.CompilerParams(
            dimension_semantics=("parallel",)),
    )(*taps)
    if Mp != rows:
        out = out[:rows]
    return out.reshape(N, oh, ow, C)


# ----------------------------------------------------------------------------
# ResNet-18 definition (deterministic synthetic parameters)
# ----------------------------------------------------------------------------
def fold_bn(gamma, beta, mean, var, eps=1e-5):
    s = gamma / jnp.sqrt(var + eps)
    b = beta - mean * s
    return s, b


def init_bn(key, c):
    k1, k2, k3, k4 = jax.random.split(key, 4)
    gamma = jax.random.uniform(k1, (c,), minval=0.5, maxval=1.5)
    beta = 0.1 * jax.random.normal(k2, (c,))
    mean = 0.1 * jax.random.normal(k3, (c,))
    var = jax.random.uniform(k4, (c,), minval=0.5, maxval=1.5)
    return fold_bn(gamma, beta, mean, var)


def init_conv_matrix(key, cout, cin, k):
    """He-init conv in PyTorch layout, pre-transformed to (k*k*cin, cout) bf16."""
    fan_in = cin * k * k
    w = jax.random.normal(key, (cout, cin, k, k)) * (2.0 / fan_in) ** 0.5
    wm = jnp.transpose(w, (2, 3, 1, 0)).reshape(k * k * cin, cout)
    return wm.astype(jnp.bfloat16)


def init_resnet18_params(key, num_classes):
    keys = iter(jax.random.split(key, 128))
    params = {
        "conv1_wm": init_conv_matrix(next(keys), 64, 3, 7),
        "bn1": init_bn(next(keys), 64),
    }
    layers = []
    in_c = 64
    for stage, out_c in enumerate([64, 128, 256, 512]):
        blocks = []
        for b in range(2):
            stride = 2 if (stage > 0 and b == 0) else 1
            blk = {
                "stride": stride,
                "conv1_wm": init_conv_matrix(next(keys), out_c, in_c, 3),
                "bn1": init_bn(next(keys), out_c),
                "conv2_wm": init_conv_matrix(next(keys), out_c, out_c, 3),
                "bn2": init_bn(next(keys), out_c),
            }
            if stride != 1 or in_c != out_c:
                blk["down_wm"] = init_conv_matrix(next(keys), out_c, in_c, 1)
                blk["down_bn"] = init_bn(next(keys), out_c)
            blocks.append(blk)
            in_c = out_c
        layers.append(blocks)
    params["layers"] = layers
    # head: nn.Linear(512, num_classes); pad classes to 128 once at init so the
    # head matmul output is lane-dense (no masked stores, no per-call padding).
    nc_pad = max(_round_up(num_classes, 128), 128)
    hw = jax.random.normal(next(keys), (512, num_classes)) * (1.0 / 512) ** 0.5
    params["head_w"] = jnp.pad(
        hw, ((0, 0), (0, nc_pad - num_classes))).astype(jnp.bfloat16)
    hb = 0.01 * jax.random.normal(next(keys), (num_classes,))
    params["head_b"] = jnp.pad(hb, (0, nc_pad - num_classes))
    params["num_classes"] = num_classes
    return params


def basic_block(x, blk):
    s1, b1 = blk["bn1"]
    out = conv_bn(x, blk["conv1_wm"], s1, b1, kh=3, kw=3,
                  stride=blk["stride"], pad=1, relu=True)
    if "down_wm" in blk:
        sd, bd = blk["down_bn"]
        identity = conv_bn(x, blk["down_wm"], sd, bd, kh=1, kw=1,
                           stride=blk["stride"], pad=0, relu=False)
    else:
        identity = x
    # conv2 + BN + residual add + ReLU fused into one Pallas call (bf16 res).
    s2, b2 = blk["bn2"]
    out = conv_bn(out, blk["conv2_wm"], s2, b2, kh=3, kw=3, stride=1, pad=1,
                  relu=True, residual=identity)
    return out


def resnet18_forward(params, x_nchw):
    # layout: accepts NCHW at the boundary (PyTorch), converts to NHWC inside;
    # activations flow bf16 end-to-end, matmul accumulation in f32.
    x = jnp.transpose(x_nchw, (0, 2, 3, 1)).astype(jnp.bfloat16)
    s, b = params["bn1"]
    x = conv_bn(x, params["conv1_wm"], s, b, kh=7, kw=7, stride=2, pad=3,
                relu=True)
    x = maxpool2d(x, k=3, stride=2, pad=1)
    for blocks in params["layers"]:
        for blk in blocks:
            x = basic_block(x, blk)
    # Adaptive global average pool to 1x1 -> flatten (f32 accumulation).
    feats = jnp.mean(x.astype(jnp.float32), axis=(1, 2))  # (N, 512)
    # Linear head via the same fused Pallas matmul kernel (scale=1), f32 out.
    ones = jnp.ones((params["head_w"].shape[1],), jnp.float32)
    logits = matmul_scale_bias(feats.astype(jnp.bfloat16), params["head_w"],
                               ones, params["head_b"], apply_relu=False,
                               out_dtype=jnp.float32)
    return logits[:, :params["num_classes"]]


if __name__ == "__main__":
    key = jax.random.PRNGKey(0)
    kp, kx = jax.random.split(key)
    num_classes = 10
    params = init_resnet18_params(kp, num_classes)
    x = jax.random.normal(kx, (2, 3, 32, 32), dtype=jnp.float32)  # NCHW input

    out = resnet18_forward(params, x)
    out = jax.block_until_ready(out)
    assert out.shape == (2, num_classes), out.shape
    assert bool(jnp.all(jnp.isfinite(out)))
    print("KERNEL_OK")
</pallas_src>

<mosaic_0001>
module attributes {stable_mosaic.version = 11 : i64} {
  func.func @_mm_bn_kernel(%arg0: i32, %arg1: i32, %arg2: memref<512x147xbf16, #tpu.memory_space<vmem>>, %arg3: memref<147x64xbf16, #tpu.memory_space<vmem>>, %arg4: memref<1x64xf32, #tpu.memory_space<vmem>>, %arg5: memref<1x64xf32, #tpu.memory_space<vmem>>, %arg6: memref<512x64xbf16, #tpu.memory_space<vmem>>) attributes {dimension_semantics = [#tpu.dimension_semantics<parallel>, #tpu.dimension_semantics<parallel>], iteration_bounds = array<i64: 1, 1>, scalar_prefetch = 0 : i64, scratch_operands = 0 : i64, tpu.core_type = #tpu.core_type<tc>, window_params = [{transform_indices = @transform_0, window_bounds = array<i64: 512, 147>}, {transform_indices = @transform_1, window_bounds = array<i64: 147, 64>}, {transform_indices = @transform_2, window_bounds = array<i64: 1, 64>}, {transform_indices = @transform_3, window_bounds = array<i64: 1, 64>}, {transform_indices = @transform_4, window_bounds = array<i64: 512, 64>}]} {
    %c0 = arith.constant 0 : index
    %c0_0 = arith.constant 0 : index
    %0 = vector.load %arg2[%c0, %c0_0] : memref<512x147xbf16, #tpu.memory_space<vmem>>, vector<512x147xbf16>
    %c0_1 = arith.constant 0 : index
    %c0_2 = arith.constant 0 : index
    %1 = vector.load %arg3[%c0_1, %c0_2] : memref<147x64xbf16, #tpu.memory_space<vmem>>, vector<147x64xbf16>
    %cst = arith.constant dense<0.000000e+00> : vector<512x64xf32>
    %2 = tpu.matmul %0, %1, %cst {dimension_numbers = #tpu.dot_dimension_numbers<[1], [0], [0], [1], [0, 0, 1, 1], [], []>} : vector<512x147xbf16>, vector<147x64xbf16>, vector<512x64xf32> -> vector<512x64xf32>
    %c0_3 = arith.constant 0 : index
    %c0_4 = arith.constant 0 : index
    %3 = vector.load %arg4[%c0_3, %c0_4] : memref<1x64xf32, #tpu.memory_space<vmem>>, vector<1x64xf32>
    %4 = vector.broadcast %3 : vector<1x64xf32> to vector<512x64xf32>
    %5 = arith.mulf %2, %4 : vector<512x64xf32>
    %c0_5 = arith.constant 0 : index
    %c0_6 = arith.constant 0 : index
    %6 = vector.load %arg5[%c0_5, %c0_6] : memref<1x64xf32, #tpu.memory_space<vmem>>, vector<1x64xf32>
    %7 = vector.broadcast %6 : vector<1x64xf32> to vector<512x64xf32>
    %8 = arith.addf %5, %7 : vector<512x64xf32>
    %cst_7 = arith.constant 0.000000e+00 : f32
    %9 = vector.broadcast %cst_7 : f32 to vector<512x64xf32>
    %10 = arith.maximumf %8, %9 : vector<512x64xf32>
    %11 = arith.truncf %10 : vector<512x64xf32> to vector<512x64xbf16>
    %c0_8 = arith.constant 0 : index
    %c0_9 = arith.constant 0 : index
    %12 = vector.load %arg6[%c0_8, %c0_9] : memref<512x64xbf16, #tpu.memory_space<vmem>>, vector<512x64xbf16>
    tpu.vector_store %arg6[%c0_8, %c0_9], %11 {strides = array<i32>} : memref<512x64xbf16, #tpu.memory_space<vmem>>, vector<512x64xbf16>,
    return
  }
  func.func @transform_0(%arg0: i32, %arg1: i32) -> (i32, i32) {
    %c0_i32 = arith.constant 0 : i32
    %c0_i32_0 = arith.constant 0 : i32
    return %arg0, %c0_i32 : i32, i32
  }
  func.func @transform_1(%arg0: i32, %arg1: i32) -> (i32, i32) {
    %c0_i32 = arith.constant 0 : i32
    %c0_i32_0 = arith.constant 0 : i32
    return %c0_i32, %arg1 : i32, i32
  }
  func.func @transform_2(%arg0: i32, %arg1: i32) -> (i32, i32) {
    %c0_i32 = arith.constant 0 : i32
    %c0_i32_0 = arith.constant 0 : i32
    return %c0_i32, %arg1 : i32, i32
  }
  func.func @transform_3(%arg0: i32, %arg1: i32) -> (i32, i32) {
    %c0_i32 = arith.constant 0 : i32
    %c0_i32_0 = arith.constant 0 : i32
    return %c0_i32, %arg1 : i32, i32
  }
  func.func @transform_4(%arg0: i32, %arg1: i32) -> (i32, i32) {
    %c0_i32 = arith.constant 0 : i32
    return %arg0, %arg1 : i32, i32
  }
}

</mosaic_0001>

<bundles_post_ra>
// kernel: tpu_custom_call.1
= control target key start
LH: loop header
LB: loop body
LE: loop exit
PB: predicated region body
PF: predicated region fallthrough
CT: control target
= control target key end

     0   :  { %v1734_v0 = vmov 0   ;;  %vm446_vm0 = vcmask 154624   ;;  %vm543_vm1 = vcmask 1040384   ;;  %vm544_vm2 = vcmask 1041408   ;;  %s2409_s1 = inlined_call_operand.vmem [shape: bf16[147,64], index: 1, kind: input, shape index: {}]   ;;  %s2410_s0 = inlined_call_operand.vmem [shape: bf16[512,147], index: 0, kind: input, shape index: {}]   ;;  %s2411_s2 = inlined_call_operand.vmem [shape: f32[1,64], index: 2, kind: input, shape index: {}]   ;;  %s2412_s3 = inlined_call_operand.vmem [shape: f32[1,64], index: 3, kind: input, shape index: {}]   ;;  %s2413_s4 = inlined_call_operand.vmem [shape: bf16[512,64], index: 4, kind: output, shape index: {}]  }
   0x1   :  { %550 = vmatprep.subr.bf16.mxu0 %v1734_v0  ;;  %1606 = vmatprep.subr.bf16.mxu1 %v1734_v0  ;;  %v1628_v1 = vld [vmem:[%s2409_s1 + $0x38] sm:$0xff]   ;;  %v1629_v2 = vld [vmem:[%s2409_s1 + $0x30] sm:$0xff]   ;;  %v1630_v3 = vld [vmem:[%s2409_s1 + $0x28] sm:$0xff]   ;;  %v1735_v10 = vmov 65535   ;;  %vm1301_vm3 = vcmask 519168  }
   0x2   :  { %551 = vmatpush1.bf16.msra.mxu0 %v1628_v1  ;;  %1616 = vmatpush1.bf16.msra.mxu1 %v1628_v1  ;;  %v1631_v4 = vld [vmem:[%s2409_s1 + $0x20] sm:$0xff]   ;;  %v1632_v7 = vld [vmem:[%s2409_s1 + $0x18] sm:$0xff]   ;;  %v1633_v8 = vld [vmem:[%s2409_s1 + $0x10] sm:$0xff]   ;;  %v545_v11 = vsel %vm543_vm1, 4294967295, %v1735_v10 }
   0x3   :  { %552 = vmatprep.subr.bf16.mxu0 %v1734_v0  ;;  %1607 = vmatprep.subr.bf16.mxu1 %v1734_v0  ;;  %v1640_v5 = vld [vmem:[%s2410_s0 + $0x4] ss:$8 sps:$4 sm:$0xff]   ;;  %v1636_v13 = vld [vmem:[%s2409_s1 + $0x48] ss:$0 sps:$4 sm:$0x33]   ;;  %v546_v14 = vsel %vm544_vm2, %v545_v11, 0 }
   0x4   :  { %1444 = vmatprep.mubr.msk.bf16.mxu0 %vm446_vm0, %v1640_v5  ;;  %v1643_v6 = vld [vmem:[%s2410_s0 + $0x104] ss:$8 sps:$4 sm:$0xff]   ;;  %v548_v15 = vand.u32 %v1636_v13, %v546_v14  ;;  %v1638_v17 = vld [vmem:[%s2410_s0] ss:$8 sps:$4 sm:$0xff]   ;;  %v1644_v19 = vld [vmem:[%s2410_s0 + $0x14] ss:$8 sps:$4 sm:$0xff]  }
   0x5   :  { %1460 = vmatprep.mubr.msk.bf16.mxu1 %vm446_vm0, %v1643_v6  ;;  %v1634_v9 = vld [vmem:[%s2409_s1 + $0x8] sm:$0xff]   ;;  %v1635_v12 = vld [vmem:[%s2409_s1] sm:$0xff]   ;;  %v1646_v20 = vld [vmem:[%s2410_s0 + $0x114] ss:$8 sps:$4 sm:$0xff]  }
   0x6   :  { %553 = vmatpush1.bf16.msra.mxu0 %v1629_v2  ;;  %1617 = vmatpush1.bf16.msra.mxu1 %v1629_v2  ;;  %v1637_v16 = vld [vmem:[%s2409_s1 + $0x40] sm:$0xff]   ;;  %v1648_v21 = vld [vmem:[%s2410_s0 + $0x10] ss:$8 sps:$4 sm:$0xff]   ;;  %v1656_v27 = vld [vmem:[%s2410_s0 + $0x34] ss:$8 sps:$4 sm:$0xff]  }
   0x7   :  { %554 = vmatprep.subr.bf16.mxu0 %v1734_v0  ;;  %1608 = vmatprep.subr.bf16.mxu1 %v1734_v0  ;;  %v1641_v18 = vld [vmem:[%s2410_s0 + $0x100] ss:$8 sps:$4 sm:$0xff]   ;;  %v1649_v22 = vld [vmem:[%s2410_s0 + $0x110] ss:$8 sps:$4 sm:$0xff]   ;;  %v1650_v23 = vld [vmem:[%s2410_s0 + $0x24] ss:$8 sps:$4 sm:$0xff]  }
   0x8   :  { %v1652_v24 = vld [vmem:[%s2410_s0 + $0x124] ss:$8 sps:$4 sm:$0xff]   ;;  %v1654_v25 = vld [vmem:[%s2410_s0 + $0x20] ss:$8 sps:$4 sm:$0xff]   ;;  %v1658_v28 = vld [vmem:[%s2410_s0 + $0x134] ss:$8 sps:$4 sm:$0xff]  }
   0x9   :  { %v1655_v26 = vld [vmem:[%s2410_s0 + $0x120] ss:$8 sps:$4 sm:$0xff]   ;;  %v1660_v29 = vld [vmem:[%s2410_s0 + $0x30] ss:$8 sps:$4 sm:$0xff]   ;;  %v1662_v31 = vld [vmem:[%s2410_s0 + $0x44] ss:$8 sps:$4 sm:$0xff]  }
   0xa   :  { %555 = vmatpush1.bf16.msra.mxu0 %v1630_v3  ;;  %1618 = vmatpush1.bf16.msra.mxu1 %v1630_v3  ;;  %v1661_v30 = vld [vmem:[%s2410_s0 + $0x130] ss:$8 sps:$4 sm:$0xff]   ;;  %v1664_v32 = vld [vmem:[%s2410_s0 + $0x144] ss:$8 sps:$4 sm:$0xff]   ;;  %v1666_v33 = vld [vmem:[%s2410_s0 + $0x40] ss:$8 sps:$4 sm:$0xff]  }
   0xb   :  { %556 = vmatprep.subr.bf16.mxu0 %v1734_v0  ;;  %1609 = vmatprep.subr.bf16.mxu1 %v1734_v0  ;;  %v1667_v34 = vld [vmem:[%s2410_s0 + $0x140] ss:$8 sps:$4 sm:$0xff]   ;;  %v1668_v35 = vld [vmem:[%s2410_s0 + $0x54] ss:$8 sps:$4 sm:$0xff]   ;;  %v1672_v37 = vld [vmem:[%s2410_s0 + $0x50] ss:$8 sps:$4 sm:$0xff]  }
   0xc   :  { %v1670_v36 = vld [vmem:[%s2410_s0 + $0x154] ss:$8 sps:$4 sm:$0xff]   ;;  %v1673_v38 = vld [vmem:[%s2410_s0 + $0x150] ss:$8 sps:$4 sm:$0xff]   ;;  %v1674_v39 = vld [vmem:[%s2410_s0 + $0x64] ss:$8 sps:$4 sm:$0xff]  }
   0xd   :  { %v1676_v40 = vld [vmem:[%s2410_s0 + $0x164] ss:$8 sps:$4 sm:$0xff]   ;;  %v1678_v41 = vld [vmem:[%s2410_s0 + $0x60] ss:$8 sps:$4 sm:$0xff]   ;;  %v1680_v43 = vld [vmem:[%s2410_s0 + $0x74] ss:$8 sps:$4 sm:$0xff]  }
   0xe   :  { %557 = vmatpush1.bf16.msra.mxu0 %v1631_v4  ;;  %1619 = vmatpush1.bf16.msra.mxu1 %v1631_v4  ;;  %v1679_v42 = vld [vmem:[%s2410_s0 + $0x160] ss:$8 sps:$4 sm:$0xff]   ;;  %v1682_v44 = vld [vmem:[%s2410_s0 + $0x174] ss:$8 sps:$4 sm:$0xff]   ;;  %v1684_v45 = vld [vmem:[%s2410_s0 + $0x70] ss:$8 sps:$4 sm:$0xff]  }
   0xf   :  { %558 = vmatprep.subr.bf16.mxu0 %v1734_v0  ;;  %1610 = vmatprep.subr.bf16.mxu1 %v1734_v0  ;;  %v1685_v46 = vld [vmem:[%s2410_s0 + $0x170] ss:$8 sps:$4 sm:$0xff]   ;;  %v1686_v47 = vld [vmem:[%s2410_s0 + $0x84] ss:$8 sps:$4 sm:$0xff]   ;;  %v1690_v49 = vld [vmem:[%s2410_s0 + $0x80] ss:$8 sps:$4 sm:$0xff]  }
  0x10   :  { %v1688_v48 = vld [vmem:[%s2410_s0 + $0x184] ss:$8 sps:$4 sm:$0xff]   ;;  %v1691_v50 = vld [vmem:[%s2410_s0 + $0x180] ss:$8 sps:$4 sm:$0xff]   ;;  %v1692_v51 = vld [vmem:[%s2410_s0 + $0x94] ss:$8 sps:$4 sm:$0xff]  }
  0x11   :  { %v1694_v52 = vld [vmem:[%s2410_s0 + $0x194] ss:$8 sps:$4 sm:$0xff]   ;;  %v1696_v53 = vld [vmem:[%s2410_s0 + $0x90] ss:$8 sps:$4 sm:$0xff]   ;;  %v1698_v55 = vld [vmem:[%s2410_s0 + $0xa4] ss:$8 sps:$4 sm:$0xff]  }
  0x12   :  { %559 = vmatpush1.bf16.msra.mxu0 %v1632_v7  ;;  %1620 = vmatpush1.bf16.msra.mxu1 %v1632_v7  ;;  %v1697_v54 = vld [vmem:[%s2410_s0 + $0x190] ss:$8 sps:$4 sm:$0xff]   ;;  %v1700_v56 = vld [vmem:[%s2410_s0 + $0x1a4] ss:$8 sps:$4 sm:$0xff]   ;;  %v1702_v57 = vld [vmem:[%s2410_s0 + $0xa0] ss:$8 sps:$4 sm:$0xff]  }
  0x13   :  { %560 = vmatprep.subr.bf16.mxu0 %v1734_v0  ;;  %1611 = vmatprep.subr.bf16.mxu1 %v1734_v0  ;;  %v1703_v58 = vld [vmem:[%s2410_s0 + $0x1a0] ss:$8 sps:$4 sm:$0xff]   ;;  %v1704_v59 = vld [vmem:[%s2410_s0 + $0xb4] ss:$8 sps:$4 sm:$0xff]   ;;  %v1708_v61 = vld [vmem:[%s2410_s0 + $0xb0] ss:$8 sps:$4 sm:$0xff]  }
  0x14   :  { %v1706_v60 = vld [vmem:[%s2410_s0 + $0x1b4] ss:$8 sps:$4 sm:$0xff]   ;;  %v1709_v62 = vld [vmem:[%s2410_s0 + $0x1b0] ss:$8 sps:$4 sm:$0xff]   ;;  %v1710_v63 = vld [vmem:[%s2410_s0 + $0xc4] ss:$8 sps:$4 sm:$0xff]  }
  0x15   :  { %v1714_v1 = vld [vmem:[%s2410_s0 + $0xc0] ss:$8 sps:$4 sm:$0xff]   ;;  %v1716_v3 = vld [vmem:[%s2410_s0 + $0xd4] ss:$8 sps:$4 sm:$0xff]   ;;  %v1720_v5 = vld [vmem:[%s2410_s0 + $0xd0] ss:$8 sps:$4 sm:$0xff]  }
  0x16   :  { %561 = vmatpush1.bf16.msra.mxu0 %v1633_v8  ;;  %1621 = vmatpush1.bf16.msra.mxu1 %v1633_v8  ;;  %v1715_v2 = vld [vmem:[%s2410_s0 + $0x1c0] ss:$8 sps:$4 sm:$0xff]   ;;  %v1718_v4 = vld [vmem:[%s2410_s0 + $0x1d4] ss:$8 sps:$4 sm:$0xff]   ;;  %v1721_v6 = vld [vmem:[%s2410_s0 + $0x1d0] ss:$8 sps:$4 sm:$0xff]  }
  0x17   :  { %562 = vmatprep.subr.bf16.mxu0 %v1734_v0  ;;  %1612 = vmatprep.subr.bf16.mxu1 %v1734_v0  ;;  %v1722_v7 = vld [vmem:[%s2410_s0 + $0xe4] ss:$8 sps:$4 sm:$0xff]   ;;  %v1727_v10 = vld [vmem:[%s2410_s0 + $0x1e0] ss:$8 sps:$4 sm:$0xff]   ;;  %v1728_v11 = vld [vmem:[%s2410_s0 + $0xf4] ss:$8 sps:$4 sm:$0xff]  }
  0x18   :  { %v1724_v8 = vld [vmem:[%s2410_s0 + $0x1e4] ss:$8 sps:$4 sm:$0xff]   ;;  %v1732_v13 = vld [vmem:[%s2410_s0 + $0xf0] ss:$8 sps:$4 sm:$0xff]  }
  0x19   :  { %v1733_v14 = vld [vmem:[%s2410_s0 + $0x1f0] ss:$8 sps:$4 sm:$0xff]  }
  0x1a   :  { %563 = vmatpush1.bf16.msra.mxu0 %v1634_v9  ;;  %1622 = vmatpush1.bf16.msra.mxu1 %v1634_v9  ;;  %v1726_v9 = vld [vmem:[%s2410_s0 + $0xe0] ss:$8 sps:$4 sm:$0xff]  }
  0x1b   :  { %564 = vmatprep.subr.bf16.mxu0 %v1734_v0  ;;  %1613 = vmatprep.subr.bf16.mxu1 %v1734_v0 }
  0x1e   :  { %565 = vmatpush1.bf16.msra.mxu0 %v1635_v12  ;;  %1623 = vmatpush1.bf16.msra.mxu1 %v1635_v12  ;;  %v1730_v12 = vld [vmem:[%s2410_s0 + $0x1f4] ss:$8 sps:$4 sm:$0xff]  }
  0x1f   :  { %578 = vmatprep.subr.bf16.mxu0 %v1734_v0  ;;  %1614 = vmatprep.subr.bf16.mxu1 %v1734_v0 }
  0x22   :  { %579 = vmatpush2.bf16.msra.mxu0 %v548_v15  ;;  %1624 = vmatpush2.bf16.msra.mxu1 %v548_v15  ;;  %v2018_v15 = vld [vmem:[%s2411_s2] ss:$0 sm:$0xff] }
  0x23   :  { %580 = vmatprep.subr.bf16.mxu0 %v1734_v0  ;;  %1615 = vmatprep.subr.bf16.mxu1 %v1734_v0  ;;  %v1712_v0 = vld [vmem:[%s2410_s0 + $0x1c4] ss:$8 sps:$4 sm:$0xff]  }
  0x26   :  { %581 = vmatpush2.bf16.msra.mxu0 %v1637_v16  ;;  %1625 = vmatpush2.bf16.msra.mxu1 %v1637_v16 }
  0x29   :  { %583 = vmatmul.mubr.bf16.vlgmr.msra.gmra.mxu0 %v1638_v17  ;;  %711 = vmatmul.mubr.bf16.vlgmr.msra.gmra.mxu1 %v1641_v18  ;;  %v2023_v17 = vld [vmem:[%s2412_s3] ss:$0 sm:$0xff] }
  0x2a   :  { %1445 = vmatprep.mubr.msk.bf16.mxu0 %vm446_vm0, %v1644_v19  ;;  %1461 = vmatprep.mubr.msk.bf16.mxu1 %vm446_vm0, %v1646_v20 }
  0x31   :  { %591 = vmatmul.mubr.bf16.gmra.mxu0 %v1648_v21  ;;  %719 = vmatmul.mubr.bf16.gmra.mxu1 %v1649_v22 }
  0x32   :  { %1446 = vmatprep.mubr.msk.bf16.mxu0 %vm446_vm0, %v1650_v23  ;;  %1462 = vmatprep.mubr.msk.bf16.mxu1 %vm446_vm0, %v1652_v24 }
  0x39   :  { %599 = vmatmul.mubr.bf16.gmra.mxu0 %v1654_v25  ;;  %727 = vmatmul.mubr.bf16.gmra.mxu1 %v1655_v26 }
  0x3a   :  { %1447 = vmatprep.mubr.msk.bf16.mxu0 %vm446_vm0, %v1656_v27  ;;  %1463 = vmatprep.mubr.msk.bf16.mxu1 %vm446_vm0, %v1658_v28 }
  0x41   :  { %607 = vmatmul.mubr.bf16.gmra.mxu0 %v1660_v29  ;;  %735 = vmatmul.mubr.bf16.gmra.mxu1 %v1661_v30 }
  0x42   :  { %1448 = vmatprep.mubr.msk.bf16.mxu0 %vm446_vm0, %v1662_v31  ;;  %1464 = vmatprep.mubr.msk.bf16.mxu1 %vm446_vm0, %v1664_v32 }
  0x49   :  { %615 = vmatmul.mubr.bf16.gmra.mxu0 %v1666_v33  ;;  %743 = vmatmul.mubr.bf16.gmra.mxu1 %v1667_v34 }
  0x4a   :  { %1449 = vmatprep.mubr.msk.bf16.mxu0 %vm446_vm0, %v1668_v35  ;;  %1465 = vmatprep.mubr.msk.bf16.mxu1 %vm446_vm0, %v1670_v36 }
  0x51   :  { %623 = vmatmul.mubr.bf16.gmra.mxu0 %v1672_v37  ;;  %751 = vmatmul.mubr.bf16.gmra.mxu1 %v1673_v38 }
  0x52   :  { %1450 = vmatprep.mubr.msk.bf16.mxu0 %vm446_vm0, %v1674_v39  ;;  %1466 = vmatprep.mubr.msk.bf16.mxu1 %vm446_vm0, %v1676_v40 }
  0x59   :  { %631 = vmatmul.mubr.bf16.gmra.mxu0 %v1678_v41  ;;  %759 = vmatmul.mubr.bf16.gmra.mxu1 %v1679_v42 }
  0x5a   :  { %1451 = vmatprep.mubr.msk.bf16.mxu0 %vm446_vm0, %v1680_v43  ;;  %1467 = vmatprep.mubr.msk.bf16.mxu1 %vm446_vm0, %v1682_v44 }
  0x61   :  { %639 = vmatmul.mubr.bf16.gmra.mxu0 %v1684_v45  ;;  %767 = vmatmul.mubr.bf16.gmra.mxu1 %v1685_v46 }
  0x62   :  { %1452 = vmatprep.mubr.msk.bf16.mxu0 %vm446_vm0, %v1686_v47  ;;  %1468 = vmatprep.mubr.msk.bf16.mxu1 %vm446_vm0, %v1688_v48 }
  0x69   :  { %647 = vmatmul.mubr.bf16.gmra.mxu0 %v1690_v49  ;;  %775 = vmatmul.mubr.bf16.gmra.mxu1 %v1691_v50 }
  0x6a   :  { %1453 = vmatprep.mubr.msk.bf16.mxu0 %vm446_vm0, %v1692_v51  ;;  %1469 = vmatprep.mubr.msk.bf16.mxu1 %vm446_vm0, %v1694_v52 }
  0x71   :  { %655 = vmatmul.mubr.bf16.gmra.mxu0 %v1696_v53  ;;  %783 = vmatmul.mubr.bf16.gmra.mxu1 %v1697_v54 }
  0x72   :  { %1454 = vmatprep.mubr.msk.bf16.mxu0 %vm446_vm0, %v1698_v55  ;;  %1470 = vmatprep.mubr.msk.bf16.mxu1 %vm446_vm0, %v1700_v56 }
  0x79   :  { %663 = vmatmul.mubr.bf16.gmra.mxu0 %v1702_v57  ;;  %791 = vmatmul.mubr.bf16.gmra.mxu1 %v1703_v58 }
  0x7a   :  { %1455 = vmatprep.mubr.msk.bf16.mxu0 %vm446_vm0, %v1704_v59  ;;  %1471 = vmatprep.mubr.msk.bf16.mxu1 %vm446_vm0, %v1706_v60 }
  0x81   :  { %671 = vmatmul.mubr.bf16.gmra.mxu0 %v1708_v61  ;;  %799 = vmatmul.mubr.bf16.gmra.mxu1 %v1709_v62 }
  0x82   :  { %1456 = vmatprep.mubr.msk.bf16.mxu0 %vm446_vm0, %v1710_v63  ;;  %1472 = vmatprep.mubr.msk.bf16.mxu1 %vm446_vm0, %v1712_v0 }
  0x89   :  { %679 = vmatmul.mubr.bf16.gmra.mxu0 %v1714_v1  ;;  %807 = vmatmul.mubr.bf16.gmra.mxu1 %v1715_v2 }
  0x8a   :  { %1457 = vmatprep.mubr.msk.bf16.mxu0 %vm446_vm0, %v1716_v3  ;;  %1473 = vmatprep.mubr.msk.bf16.mxu1 %vm446_vm0, %v1718_v4 }
  0x91   :  { %687 = vmatmul.mubr.bf16.gmra.mxu0 %v1720_v5  ;;  %815 = vmatmul.mubr.bf16.gmra.mxu1 %v1721_v6 }
  0x92   :  { %1458 = vmatprep.mubr.msk.bf16.mxu0 %vm446_vm0, %v1722_v7  ;;  %1474 = vmatprep.mubr.msk.bf16.mxu1 %vm446_vm0, %v1724_v8 }
  0x99   :  { %695 = vmatmul.mubr.bf16.gmra.mxu0 %v1726_v9  ;;  %823 = vmatmul.mubr.bf16.gmra.mxu1 %v1727_v10 }
  0x9a   :  { %1459 = vmatprep.mubr.msk.bf16.mxu0 %vm446_vm0, %v1728_v11  ;;  %1475 = vmatprep.mubr.msk.bf16.mxu1 %vm446_vm0, %v1730_v12 }
  0xa1   :  { %703 = vmatmul.mubr.bf16.gmra.mxu0 %v1732_v13  ;;  %831 = vmatmul.mubr.bf16.gmra.mxu1 %v1733_v14 }
  0xe9   :  { %v584_v16 = vpop.f32.mrf.mxu0  ;;  %v712_v18 = vpop.f32.mrf.mxu1 }
  0xea   :  { %v846_v19 = vmul.f32 %v2018_v15, %v584_v16  ;;  %v878_v20 = vmul.f32 %v2018_v15, %v712_v18 }
  0xeb   :  { %v586_v21 = vpop.f32.mrf.mxu0  ;;  %v714_v22 = vpop.f32.mrf.mxu1 }
  0xec   :  { %v917_v23 = vadd.f32 %v2023_v17, %v846_v19  ;;  %v949_v24 = vadd.f32 %v2023_v17, %v878_v20 }
  0xed   :  { %v587_v25 = vpop.f32.mrf.mxu0  ;;  %v715_v26 = vpop.f32.mrf.mxu1 }
  0xee   :  { %v981_v27 = vmax.f32 %v917_v23, 0.0  ;;  %v1013_v28 = vmax.f32 %v949_v24, 0.0  ;;  %v847_v29 = vmul.f32 %v2018_v15, %v587_v25  ;;  %v879_v30 = vmul.f32 %v2018_v15, %v715_v26 }
  0xef   :  { %v589_v31 = vpop.f32.mrf.mxu0  ;;  %v717_v32 = vpop.f32.mrf.mxu1 }
  0xf0   :  { %v1542_v33 = vpack.c.bf16 %v981_v27, %v981_v27  ;;  %v1574_v34 = vpack.c.bf16 %v1013_v28, %v1013_v28  ;;  %v918_v35 = vadd.f32 %v2023_v17, %v847_v29  ;;  %v950_v36 = vadd.f32 %v2023_v17, %v879_v30 }
  0xf1   :  { %v592_v37 = vpop.f32.mrf.mxu0  ;;  %v720_v38 = vpop.f32.mrf.mxu1 }
  0xf2   :  { %1302 = vst.msk [vmem:[%s2413_s4] sm:$0xf] %vm1301_vm3, %v1542_v33  ;;  %1334 = vst.msk [vmem:[%s2413_s4 + $0x80] sm:$0xf] %vm1301_vm3, %v1574_v34  ;;  %v982_v39 = vmax.f32 %v918_v35, 0.0  ;;  %v1014_v40 = vmax.f32 %v950_v36, 0.0  ;;  %v848_v41 = vmul.f32 %v2018_v15, %v592_v37  ;;  %v880_v42 = vmul.f32 %v2018_v15, %v720_v38 }
  0xf3   :  { %v594_v43 = vpop.f32.mrf.mxu0  ;;  %v722_v44 = vpop.f32.mrf.mxu1 }
  0xf4   :  { %v1543_v45 = vpack.c.bf16 %v982_v39, %v982_v39  ;;  %v1575_v46 = vpack.c.bf16 %v1014_v40, %v1014_v40  ;;  %v919_v47 = vadd.f32 %v2023_v17, %v848_v41  ;;  %v951_v48 = vadd.f32 %v2023_v17, %v880_v42 }
  0xf5   :  { %v595_v49 = vpop.f32.mrf.mxu0  ;;  %v723_v50 = vpop.f32.mrf.mxu1 }
  0xf6   :  { %1303 = vst.msk [vmem:[%s2413_s4 + $0x4] sm:$0xf] %vm1301_vm3, %v1543_v45  ;;  %1335 = vst.msk [vmem:[%s2413_s4 + $0x84] sm:$0xf] %vm1301_vm3, %v1575_v46  ;;  %v983_v51 = vmax.f32 %v919_v47, 0.0  ;;  %v1015_v52 = vmax.f32 %v951_v48, 0.0  ;;  %v849_v53 = vmul.f32 %v2018_v15, %v595_v49  ;;  %v881_v54 = vmul.f32 %v2018_v15, %v723_v50 }
  0xf7   :  { %v597_v55 = vpop.f32.mrf.mxu0  ;;  %v725_v56 = vpop.f32.mrf.mxu1 }
  0xf8   :  { %v1544_v57 = vpack.c.bf16 %v983_v51, %v983_v51  ;;  %v1576_v58 = vpack.c.bf16 %v1015_v52, %v1015_v52  ;;  %v920_v59 = vadd.f32 %v2023_v17, %v849_v53  ;;  %v952_v60 = vadd.f32 %v2023_v17, %v881_v54 }
  0xf9   :  { %v600_v61 = vpop.f32.mrf.mxu0  ;;  %v728_v62 = vpop.f32.mrf.mxu1 }
  0xfa   :  { %1304 = vst.msk [vmem:[%s2413_s4 + $0x8] sm:$0xf] %vm1301_vm3, %v1544_v57  ;;  %1336 = vst.msk [vmem:[%s2413_s4 + $0x88] sm:$0xf] %vm1301_vm3, %v1576_v58  ;;  %v984_v63 = vmax.f32 %v920_v59, 0.0  ;;  %v1016_v0 = vmax.f32 %v952_v60, 0.0  ;;  %v850_v1 = vmul.f32 %v2018_v15, %v600_v61  ;;  %v882_v2 = vmul.f32 %v2018_v15, %v728_v62 }
  0xfb   :  { %v602_v3 = vpop.f32.mrf.mxu0  ;;  %v730_v4 = vpop.f32.mrf.mxu1 }
  0xfc   :  { %v1545_v5 = vpack.c.bf16 %v984_v63, %v984_v63  ;;  %v1577_v6 = vpack.c.bf16 %v1016_v0, %v1016_v0  ;;  %v921_v7 = vadd.f32 %v2023_v17, %v850_v1  ;;  %v953_v8 = vadd.f32 %v2023_v17, %v882_v2 }
  0xfd   :  { %v603_v9 = vpop.f32.mrf.mxu0  ;;  %v731_v10 = vpop.f32.mrf.mxu1 }
  0xfe   :  { %1305 = vst.msk [vmem:[%s2413_s4 + $0xc] sm:$0xf] %vm1301_vm3, %v1545_v5  ;;  %1337 = vst.msk [vmem:[%s2413_s4 + $0x8c] sm:$0xf] %vm1301_vm3, %v1577_v6  ;;  %v985_v11 = vmax.f32 %v921_v7, 0.0  ;;  %v1017_v12 = vmax.f32 %v953_v8, 0.0  ;;  %v851_v13 = vmul.f32 %v2018_v15, %v603_v9  ;;  %v883_v14 = vmul.f32 %v2018_v15, %v731_v10 }
  0xff   :  { %v605_v16 = vpop.f32.mrf.mxu0  ;;  %v733_v18 = vpop.f32.mrf.mxu1 }
 0x100   :  { %v1546_v19 = vpack.c.bf16 %v985_v11, %v985_v11  ;;  %v1578_v20 = vpack.c.bf16 %v1017_v12, %v1017_v12  ;;  %v922_v21 = vadd.f32 %v2023_v17, %v851_v13  ;;  %v954_v22 = vadd.f32 %v2023_v17, %v883_v14 }
 0x101   :  { %v608_v23 = vpop.f32.mrf.mxu0  ;;  %v736_v24 = vpop.f32.mrf.mxu1 }
 0x102   :  { %1306 = vst.msk [vmem:[%s2413_s4 + $0x10] sm:$0xf] %vm1301_vm3, %v1546_v19  ;;  %1338 = vst.msk [vmem:[%s2413_s4 + $0x90] sm:$0xf] %vm1301_vm3, %v1578_v20  ;;  %v986_v25 = vmax.f32 %v922_v21, 0.0  ;;  %v1018_v26 = vmax.f32 %v954_v22, 0.0  ;;  %v852_v27 = vmul.f32 %v2018_v15, %v608_v23  ;;  %v884_v28 = vmul.f32 %v2018_v15, %v736_v24 }
 0x103   :  { %v610_v29 = vpop.f32.mrf.mxu0  ;;  %v738_v30 = vpop.f32.mrf.mxu1 }
 0x104   :  { %v1547_v31 = vpack.c.bf16 %v986_v25, %v986_v25  ;;  %v1579_v32 = vpack.c.bf16 %v1018_v26, %v1018_v26  ;;  %v923_v33 = vadd.f32 %v2023_v17, %v852_v27  ;;  %v955_v34 = vadd.f32 %v2023_v17, %v884_v28 }
 0x105   :  { %v611_v35 = vpop.f32.mrf.mxu0  ;;  %v739_v36 = vpop.f32.mrf.mxu1 }
 0x106   :  { %1307 = vst.msk [vmem:[%s2413_s4 + $0x14] sm:$0xf] %vm1301_vm3, %v1547_v31  ;;  %1339 = vst.msk [vmem:[%s2413_s4 + $0x94] sm:$0xf] %vm1301_vm3, %v1579_v32  ;;  %v987_v37 = vmax.f32 %v923_v33, 0.0  ;;  %v1019_v38 = vmax.f32 %v955_v34, 0.0  ;;  %v853_v39 = vmul.f32 %v2018_v15, %v611_v35  ;;  %v885_v40 = vmul.f32 %v2018_v15, %v739_v36 }
 0x107   :  { %v613_v41 = vpop.f32.mrf.mxu0  ;;  %v741_v42 = vpop.f32.mrf.mxu1 }
 0x108   :  { %v1548_v43 = vpack.c.bf16 %v987_v37, %v987_v37  ;;  %v1580_v44 = vpack.c.bf16 %v1019_v38, %v1019_v38  ;;  %v924_v45 = vadd.f32 %v2023_v17, %v853_v39  ;;  %v956_v46 = vadd.f32 %v2023_v17, %v885_v40 }
 0x109   :  { %v616_v47 = vpop.f32.mrf.mxu0  ;;  %v744_v48 = vpop.f32.mrf.mxu1 }
 0x10a   :  { %1308 = vst.msk [vmem:[%s2413_s4 + $0x18] sm:$0xf] %vm1301_vm3, %v1548_v43  ;;  %1340 = vst.msk [vmem:[%s2413_s4 + $0x98] sm:$0xf] %vm1301_vm3, %v1580_v44  ;;  %v988_v49 = vmax.f32 %v924_v45, 0.0  ;;  %v1020_v50 = vmax.f32 %v956_v46, 0.0  ;;  %v854_v51 = vmul.f32 %v2018_v15, %v616_v47  ;;  %v886_v52 = vmul.f32 %v2018_v15, %v744_v48 }
 0x10b   :  { %v618_v53 = vpop.f32.mrf.mxu0  ;;  %v746_v54 = vpop.f32.mrf.mxu1 }
 0x10c   :  { %v1549_v55 = vpack.c.bf16 %v988_v49, %v988_v49  ;;  %v1581_v56 = vpack.c.bf16 %v1020_v50, %v1020_v50  ;;  %v925_v57 = vadd.f32 %v2023_v17, %v854_v51  ;;  %v957_v58 = vadd.f32 %v2023_v17, %v886_v52 }
 0x10d   :  { %v619_v59 = vpop.f32.mrf.mxu0  ;;  %v747_v60 = vpop.f32.mrf.mxu1 }
 0x10e   :  { %1309 = vst.msk [vmem:[%s2413_s4 + $0x1c] sm:$0xf] %vm1301_vm3, %v1549_v55  ;;  %1341 = vst.msk [vmem:[%s2413_s4 + $0x9c] sm:$0xf] %vm1301_vm3, %v1581_v56  ;;  %v989_v61 = vmax.f32 %v925_v57, 0.0  ;;  %v1021_v62 = vmax.f32 %v957_v58, 0.0  ;;  %v855_v63 = vmul.f32 %v2018_v15, %v619_v59  ;;  %v887_v0 = vmul.f32 %v2018_v15, %v747_v60 }
 0x10f   :  { %v621_v1 = vpop.f32.mrf.mxu0  ;;  %v749_v2 = vpop.f32.mrf.mxu1 }
 0x110   :  { %v1550_v3 = vpack.c.bf16 %v989_v61, %v989_v61  ;;  %v1582_v4 = vpack.c.bf16 %v1021_v62, %v1021_v62  ;;  %v926_v5 = vadd.f32 %v2023_v17, %v855_v63  ;;  %v958_v6 = vadd.f32 %v2023_v17, %v887_v0 }
 0x111   :  { %v624_v7 = vpop.f32.mrf.mxu0  ;;  %v752_v8 = vpop.f32.mrf.mxu1 }
 0x112   :  { %1310 = vst.msk [vmem:[%s2413_s4 + $0x20] sm:$0xf] %vm1301_vm3, %v1550_v3  ;;  %1342 = vst.msk [vmem:[%s2413_s4 + $0xa0] sm:$0xf] %vm1301_vm3, %v1582_v4  ;;  %v990_v9 = vmax.f32 %v926_v5, 0.0  ;;  %v1022_v10 = vmax.f32 %v958_v6, 0.0  ;;  %v856_v11 = vmul.f32 %v2018_v15, %v624_v7  ;;  %v888_v12 = vmul.f32 %v2018_v15, %v752_v8 }
 0x113   :  { %v626_v13 = vpop.f32.mrf.mxu0  ;;  %v754_v14 = vpop.f32.mrf.mxu1 }
 0x114   :  { %v1551_v16 = vpack.c.bf16 %v990_v9, %v990_v9  ;;  %v1583_v18 = vpack.c.bf16 %v1022_v10, %v1022_v10  ;;  %v927_v19 = vadd.f32 %v2023_v17, %v856_v11  ;;  %v959_v20 = vadd.f32 %v2023_v17, %v888_v12 }
 0x115   :  { %v627_v21 = vpop.f32.mrf.mxu0  ;;  %v755_v22 = vpop.f32.mrf.mxu1 }
 0x116   :  { %1311 = vst.msk [vmem:[%s2413_s4 + $0x24] sm:$0xf] %vm1301_vm3, %v1551_v16  ;;  %1343 = vst.msk [vmem:[%s2413_s4 + $0xa4] sm:$0xf] %vm1301_vm3, %v1583_v18  ;;  %v991_v23 = vmax.f32 %v927_v19, 0.0  ;;  %v1023_v24 = vmax.f32 %v959_v20, 0.0  ;;  %v857_v25 = vmul.f32 %v2018_v15, %v627_v21  ;;  %v889_v26 = vmul.f32 %v2018_v15, %v755_v22 }
 0x117   :  { %v629_v27 = vpop.f32.mrf.mxu0  ;;  %v757_v28 = vpop.f32.mrf.mxu1 }
 0x118   :  { %v1552_v29 = vpack.c.bf16 %v991_v23, %v991_v23  ;;  %v1584_v30 = vpack.c.bf16 %v1023_v24, %v1023_v24  ;;  %v928_v31 = vadd.f32 %v2023_v17, %v857_v25  ;;  %v960_v32 = vadd.f32 %v2023_v17, %v889_v26 }
 0x119   :  { %v632_v33 = vpop.f32.mrf.mxu0  ;;  %v760_v34 = vpop.f32.mrf.mxu1 }
 0x11a   :  { %1312 = vst.msk [vmem:[%s2413_s4 + $0x28] sm:$0xf] %vm1301_vm3, %v1552_v29  ;;  %1344 = vst.msk [vmem:[%s2413_s4 + $0xa8] sm:$0xf] %vm1301_vm3, %v1584_v30  ;;  %v992_v35 = vmax.f32 %v928_v31, 0.0  ;;  %v1024_v36 = vmax.f32 %v960_v32, 0.0  ;;  %v858_v37 = vmul.f32 %v2018_v15, %v632_v33  ;;  %v890_v38 = vmul.f32 %v2018_v15, %v760_v34 }
 0x11b   :  { %v634_v39 = vpop.f32.mrf.mxu0  ;;  %v762_v40 = vpop.f32.mrf.mxu1 }
 0x11c   :  { %v1553_v41 = vpack.c.bf16 %v992_v35, %v992_v35  ;;  %v1585_v42 = vpack.c.bf16 %v1024_v36, %v1024_v36  ;;  %v929_v43 = vadd.f32 %v2023_v17, %v858_v37  ;;  %v961_v44 = vadd.f32 %v2023_v17, %v890_v38 }
 0x11d   :  { %v635_v45 = vpop.f32.mrf.mxu0  ;;  %v763_v46 = vpop.f32.mrf.mxu1 }
 0x11e   :  { %1313 = vst.msk [vmem:[%s2413_s4 + $0x2c] sm:$0xf] %vm1301_vm3, %v1553_v41  ;;  %1345 = vst.msk [vmem:[%s2413_s4 + $0xac] sm:$0xf] %vm1301_vm3, %v1585_v42  ;;  %v993_v47 = vmax.f32 %v929_v43, 0.0  ;;  %v1025_v48 = vmax.f32 %v961_v44, 0.0  ;;  %v859_v49 = vmul.f32 %v2018_v15, %v635_v45  ;;  %v891_v50 = vmul.f32 %v2018_v15, %v763_v46 }
 0x11f   :  { %v637_v51 = vpop.f32.mrf.mxu0  ;;  %v765_v52 = vpop.f32.mrf.mxu1 }
 0x120   :  { %v1554_v53 = vpack.c.bf16 %v993_v47, %v993_v47  ;;  %v1586_v54 = vpack.c.bf16 %v1025_v48, %v1025_v48  ;;  %v930_v55 = vadd.f32 %v2023_v17, %v859_v49  ;;  %v962_v56 = vadd.f32 %v2023_v17, %v891_v50 }
 0x121   :  { %v640_v57 = vpop.f32.mrf.mxu0  ;;  %v768_v58 = vpop.f32.mrf.mxu1 }
 0x122   :  { %1314 = vst.msk [vmem:[%s2413_s4 + $0x30] sm:$0xf] %vm1301_vm3, %v1554_v53  ;;  %1346 = vst.msk [vmem:[%s2413_s4 + $0xb0] sm:$0xf] %vm1301_vm3, %v1586_v54  ;;  %v994_v59 = vmax.f32 %v930_v55, 0.0  ;;  %v1026_v60 = vmax.f32 %v962_v56, 0.0  ;;  %v860_v61 = vmul.f32 %v2018_v15, %v640_v57  ;;  %v892_v62 = vmul.f32 %v2018_v15, %v768_v58 }
 0x123   :  { %v642_v63 = vpop.f32.mrf.mxu0  ;;  %v770_v0 = vpop.f32.mrf.mxu1 }
 0x124   :  { %v1555_v1 = vpack.c.bf16 %v994_v59, %v994_v59  ;;  %v1587_v2 = vpack.c.bf16 %v1026_v60, %v1026_v60  ;;  %v931_v3 = vadd.f32 %v2023_v17, %v860_v61  ;;  %v963_v4 = vadd.f32 %v2023_v17, %v892_v62 }
 0x125   :  { %v643_v5 = vpop.f32.mrf.mxu0  ;;  %v771_v6 = vpop.f32.mrf.mxu1 }
 0x126   :  { %1315 = vst.msk [vmem:[%s2413_s4 + $0x34] sm:$0xf] %vm1301_vm3, %v1555_v1  ;;  %1347 = vst.msk [vmem:[%s2413_s4 + $0xb4] sm:$0xf] %vm1301_vm3, %v1587_v2  ;;  %v995_v7 = vmax.f32 %v931_v3, 0.0  ;;  %v1027_v8 = vmax.f32 %v963_v4, 0.0  ;;  %v861_v9 = vmul.f32 %v2018_v15, %v643_v5  ;;  %v893_v10 = vmul.f32 %v2018_v15, %v771_v6 }
 0x127   :  { %v645_v11 = vpop.f32.mrf.mxu0  ;;  %v773_v12 = vpop.f32.mrf.mxu1 }
 0x128   :  { %v1556_v13 = vpack.c.bf16 %v995_v7, %v995_v7  ;;  %v1588_v14 = vpack.c.bf16 %v1027_v8, %v1027_v8  ;;  %v932_v16 = vadd.f32 %v2023_v17, %v861_v9  ;;  %v964_v18 = vadd.f32 %v2023_v17, %v893_v10 }
 0x129   :  { %v648_v19 = vpop.f32.mrf.mxu0  ;;  %v776_v20 = vpop.f32.mrf.mxu1 }
 0x12a   :  { %1316 = vst.msk [vmem:[%s2413_s4 + $0x38] sm:$0xf] %vm1301_vm3, %v1556_v13  ;;  %1348 = vst.msk [vmem:[%s2413_s4 + $0xb8] sm:$0xf] %vm1301_vm3, %v1588_v14  ;;  %v996_v21 = vmax.f32 %v932_v16, 0.0  ;;  %v1028_v22 = vmax.f32 %v964_v18, 0.0  ;;  %v862_v23 = vmul.f32 %v2018_v15, %v648_v19  ;;  %v894_v24 = vmul.f32 %v2018_v15, %v776_v20 }
 0x12b   :  { %v650_v25 = vpop.f32.mrf.mxu0  ;;  %v778_v26 = vpop.f32.mrf.mxu1 }
 0x12c   :  { %v1557_v27 = vpack.c.bf16 %v996_v21, %v996_v21  ;;  %v1589_v28 = vpack.c.bf16 %v1028_v22, %v1028_v22  ;;  %v933_v29 = vadd.f32 %v2023_v17, %v862_v23  ;;  %v965_v30 = vadd.f32 %v2023_v17, %v894_v24 }
 0x12d   :  { %v651_v31 = vpop.f32.mrf.mxu0  ;;  %v779_v32 = vpop.f32.mrf.mxu1 }
 0x12e   :  { %1317 = vst.msk [vmem:[%s2413_s4 + $0x3c] sm:$0xf] %vm1301_vm3, %v1557_v27  ;;  %1349 = vst.msk [vmem:[%s2413_s4 + $0xbc] sm:$0xf] %vm1301_vm3, %v1589_v28  ;;  %v997_v33 = vmax.f32 %v933_v29, 0.0  ;;  %v1029_v34 = vmax.f32 %v965_v30, 0.0  ;;  %v863_v35 = vmul.f32 %v2018_v15, %v651_v31  ;;  %v895_v36 = vmul.f32 %v2018_v15, %v779_v32 }
 0x12f   :  { %v653_v37 = vpop.f32.mrf.mxu0  ;;  %v781_v38 = vpop.f32.mrf.mxu1 }
 0x130   :  { %v1558_v39 = vpack.c.bf16 %v997_v33, %v997_v33  ;;  %v1590_v40 = vpack.c.bf16 %v1029_v34, %v1029_v34  ;;  %v934_v41 = vadd.f32 %v2023_v17, %v863_v35  ;;  %v966_v42 = vadd.f32 %v2023_v17, %v895_v36 }
 0x131   :  { %v656_v43 = vpop.f32.mrf.mxu0  ;;  %v784_v44 = vpop.f32.mrf.mxu1 }
 0x132   :  { %1318 = vst.msk [vmem:[%s2413_s4 + $0x40] sm:$0xf] %vm1301_vm3, %v1558_v39  ;;  %1350 = vst.msk [vmem:[%s2413_s4 + $0xc0] sm:$0xf] %vm1301_vm3, %v1590_v40  ;;  %v998_v45 = vmax.f32 %v934_v41, 0.0  ;;  %v1030_v46 = vmax.f32 %v966_v42, 0.0  ;;  %v864_v47 = vmul.f32 %v2018_v15, %v656_v43  ;;  %v896_v48 = vmul.f32 %v2018_v15, %v784_v44 }
 0x133   :  { %v658_v49 = vpop.f32.mrf.mxu0  ;;  %v786_v50 = vpop.f32.mrf.mxu1 }
 0x134   :  { %v1559_v51 = vpack.c.bf16 %v998_v45, %v998_v45  ;;  %v1591_v52 = vpack.c.bf16 %v1030_v46, %v1030_v46  ;;  %v935_v53 = vadd.f32 %v2023_v17, %v864_v47  ;;  %v967_v54 = vadd.f32 %v2023_v17, %v896_v48 }
 0x135   :  { %v659_v55 = vpop.f32.mrf.mxu0  ;;  %v787_v56 = vpop.f32.mrf.mxu1 }
 0x136   :  { %1319 = vst.msk [vmem:[%s2413_s4 + $0x44] sm:$0xf] %vm1301_vm3, %v1559_v51  ;;  %1351 = vst.msk [vmem:[%s2413_s4 + $0xc4] sm:$0xf] %vm1301_vm3, %v1591_v52  ;;  %v999_v57 = vmax.f32 %v935_v53, 0.0  ;;  %v1031_v58 = vmax.f32 %v967_v54, 0.0  ;;  %v865_v59 = vmul.f32 %v2018_v15, %v659_v55  ;;  %v897_v60 = vmul.f32 %v2018_v15, %v787_v56 }
 0x137   :  { %v661_v61 = vpop.f32.mrf.mxu0  ;;  %v789_v62 = vpop.f32.mrf.mxu1 }
 0x138   :  { %v1560_v63 = vpack.c.bf16 %v999_v57, %v999_v57  ;;  %v1592_v0 = vpack.c.bf16 %v1031_v58, %v1031_v58  ;;  %v936_v1 = vadd.f32 %v2023_v17, %v865_v59  ;;  %v968_v2 = vadd.f32 %v2023_v17, %v897_v60 }
 0x139   :  { %v664_v3 = vpop.f32.mrf.mxu0  ;;  %v792_v4 = vpop.f32.mrf.mxu1 }
 0x13a   :  { %1320 = vst.msk [vmem:[%s2413_s4 + $0x48] sm:$0xf] %vm1301_vm3, %v1560_v63  ;;  %1352 = vst.msk [vmem:[%s2413_s4 + $0xc8] sm:$0xf] %vm1301_vm3, %v1592_v0  ;;  %v1000_v5 = vmax.f32 %v936_v1, 0.0  ;;  %v1032_v6 = vmax.f32 %v968_v2, 0.0  ;;  %v866_v7 = vmul.f32 %v2018_v15, %v664_v3  ;;  %v898_v8 = vmul.f32 %v2018_v15, %v792_v4 }
 0x13b   :  { %v666_v9 = vpop.f32.mrf.mxu0  ;;  %v794_v10 = vpop.f32.mrf.mxu1 }
 0x13c   :  { %v1561_v11 = vpack.c.bf16 %v1000_v5, %v1000_v5  ;;  %v1593_v12 = vpack.c.bf16 %v1032_v6, %v1032_v6  ;;  %v937_v13 = vadd.f32 %v2023_v17, %v866_v7  ;;  %v969_v14 = vadd.f32 %v2023_v17, %v898_v8 }
 0x13d   :  { %v667_v16 = vpop.f32.mrf.mxu0  ;;  %v795_v18 = vpop.f32.mrf.mxu1 }
 0x13e   :  { %1321 = vst.msk [vmem:[%s2413_s4 + $0x4c] sm:$0xf] %vm1301_vm3, %v1561_v11  ;;  %1353 = vst.msk [vmem:[%s2413_s4 + $0xcc] sm:$0xf] %vm1301_vm3, %v1593_v12  ;;  %v1001_v19 = vmax.f32 %v937_v13, 0.0  ;;  %v1033_v20 = vmax.f32 %v969_v14, 0.0  ;;  %v867_v21 = vmul.f32 %v2018_v15, %v667_v16  ;;  %v899_v22 = vmul.f32 %v2018_v15, %v795_v18 }
 0x13f   :  { %v669_v23 = vpop.f32.mrf.mxu0  ;;  %v797_v24 = vpop.f32.mrf.mxu1 }
 0x140   :  { %v1562_v25 = vpack.c.bf16 %v1001_v19, %v1001_v19  ;;  %v1594_v26 = vpack.c.bf16 %v1033_v20, %v1033_v20  ;;  %v938_v27 = vadd.f32 %v2023_v17, %v867_v21  ;;  %v970_v28 = vadd.f32 %v2023_v17, %v899_v22 }
 0x141   :  { %v672_v29 = vpop.f32.mrf.mxu0  ;;  %v800_v30 = vpop.f32.mrf.mxu1 }
 0x142   :  { %1322 = vst.msk [vmem:[%s2413_s4 + $0x50] sm:$0xf] %vm1301_vm3, %v1562_v25  ;;  %1354 = vst.msk [vmem:[%s2413_s4 + $0xd0] sm:$0xf] %vm1301_vm3, %v1594_v26  ;;  %v1002_v31 = vmax.f32 %v938_v27, 0.0  ;;  %v1034_v32 = vmax.f32 %v970_v28, 0.0  ;;  %v868_v33 = vmul.f32 %v2018_v15, %v672_v29  ;;  %v900_v34 = vmul.f32 %v2018_v15, %v800_v30 }
 0x143   :  { %v674_v35 = vpop.f32.mrf.mxu0  ;;  %v802_v36 = vpop.f32.mrf.mxu1 }
 0x144   :  { %v1563_v37 = vpack.c.bf16 %v1002_v31, %v1002_v31  ;;  %v1595_v38 = vpack.c.bf16 %v1034_v32, %v1034_v32  ;;  %v939_v39 = vadd.f32 %v2023_v17, %v868_v33  ;;  %v971_v40 = vadd.f32 %v2023_v17, %v900_v34 }
 0x145   :  { %v675_v41 = vpop.f32.mrf.mxu0  ;;  %v803_v42 = vpop.f32.mrf.mxu1 }
 0x146   :  { %1323 = vst.msk [vmem:[%s2413_s4 + $0x54] sm:$0xf] %vm1301_vm3, %v1563_v37  ;;  %1355 = vst.msk [vmem:[%s2413_s4 + $0xd4] sm:$0xf] %vm1301_vm3, %v1595_v38  ;;  %v1003_v43 = vmax.f32 %v939_v39, 0.0  ;;  %v1035_v44 = vmax.f32 %v971_v40, 0.0  ;;  %v869_v45 = vmul.f32 %v2018_v15, %v675_v41  ;;  %v901_v46 = vmul.f32 %v2018_v15, %v803_v42 }
 0x147   :  { %v677_v47 = vpop.f32.mrf.mxu0  ;;  %v805_v48 = vpop.f32.mrf.mxu1 }
 0x148   :  { %v1564_v49 = vpack.c.bf16 %v1003_v43, %v1003_v43  ;;  %v1596_v50 = vpack.c.bf16 %v1035_v44, %v1035_v44  ;;  %v940_v51 = vadd.f32 %v2023_v17, %v869_v45  ;;  %v972_v52 = vadd.f32 %v2023_v17, %v901_v46 }
 0x149   :  { %v680_v53 = vpop.f32.mrf.mxu0  ;;  %v808_v54 = vpop.f32.mrf.mxu1 }
 0x14a   :  { %1324 = vst.msk [vmem:[%s2413_s4 + $0x58] sm:$0xf] %vm1301_vm3, %v1564_v49  ;;  %1356 = vst.msk [vmem:[%s2413_s4 + $0xd8] sm:$0xf] %vm1301_vm3, %v1596_v50  ;;  %v1004_v55 = vmax.f32 %v940_v51, 0.0  ;;  %v1036_v56 = vmax.f32 %v972_v52, 0.0  ;;  %v870_v57 = vmul.f32 %v2018_v15, %v680_v53  ;;  %v902_v58 = vmul.f32 %v2018_v15, %v808_v54 }
 0x14b   :  { %v682_v59 = vpop.f32.mrf.mxu0  ;;  %v810_v60 = vpop.f32.mrf.mxu1 }
 0x14c   :  { %v1565_v61 = vpack.c.bf16 %v1004_v55, %v1004_v55  ;;  %v1597_v62 = vpack.c.bf16 %v1036_v56, %v1036_v56  ;;  %v941_v63 = vadd.f32 %v2023_v17, %v870_v57  ;;  %v973_v0 = vadd.f32 %v2023_v17, %v902_v58 }
 0x14d   :  { %v683_v1 = vpop.f32.mrf.mxu0  ;;  %v811_v2 = vpop.f32.mrf.mxu1 }
 0x14e   :  { %1325 = vst.msk [vmem:[%s2413_s4 + $0x5c] sm:$0xf] %vm1301_vm3, %v1565_v61  ;;  %1357 = vst.msk [vmem:[%s2413_s4 + $0xdc] sm:$0xf] %vm1301_vm3, %v1597_v62  ;;  %v1005_v3 = vmax.f32 %v941_v63, 0.0  ;;  %v1037_v4 = vmax.f32 %v973_v0, 0.0  ;;  %v871_v5 = vmul.f32 %v2018_v15, %v683_v1  ;;  %v903_v6 = vmul.f32 %v2018_v15, %v811_v2 }
 0x14f   :  { %v685_v7 = vpop.f32.mrf.mxu0  ;;  %v813_v8 = vpop.f32.mrf.mxu1 }
 0x150   :  { %v1566_v9 = vpack.c.bf16 %v1005_v3, %v1005_v3  ;;  %v1598_v10 = vpack.c.bf16 %v1037_v4, %v1037_v4  ;;  %v942_v11 = vadd.f32 %v2023_v17, %v871_v5  ;;  %v974_v12 = vadd.f32 %v2023_v17, %v903_v6 }
 0x151   :  { %v688_v13 = vpop.f32.mrf.mxu0  ;;  %v816_v14 = vpop.f32.mrf.mxu1 }
 0x152   :  { %1326 = vst.msk [vmem:[%s2413_s4 + $0x60] sm:$0xf] %vm1301_vm3, %v1566_v9  ;;  %1358 = vst.msk [vmem:[%s2413_s4 + $0xe0] sm:$0xf] %vm1301_vm3, %v1598_v10  ;;  %v1006_v16 = vmax.f32 %v942_v11, 0.0  ;;  %v1038_v18 = vmax.f32 %v974_v12, 0.0  ;;  %v872_v19 = vmul.f32 %v2018_v15, %v688_v13  ;;  %v904_v20 = vmul.f32 %v2018_v15, %v816_v14 }
 0x153   :  { %v690_v21 = vpop.f32.mrf.mxu0  ;;  %v818_v22 = vpop.f32.mrf.mxu1 }
 0x154   :  { %v1567_v23 = vpack.c.bf16 %v1006_v16, %v1006_v16  ;;  %v1599_v24 = vpack.c.bf16 %v1038_v18, %v1038_v18  ;;  %v943_v25 = vadd.f32 %v2023_v17, %v872_v19  ;;  %v975_v26 = vadd.f32 %v2023_v17, %v904_v20 }
 0x155   :  { %v691_v27 = vpop.f32.mrf.mxu0  ;;  %v819_v28 = vpop.f32.mrf.mxu1 }
 0x156   :  { %1327 = vst.msk [vmem:[%s2413_s4 + $0x64] sm:$0xf] %vm1301_vm3, %v1567_v23  ;;  %1359 = vst.msk [vmem:[%s2413_s4 + $0xe4] sm:$0xf] %vm1301_vm3, %v1599_v24  ;;  %v1007_v29 = vmax.f32 %v943_v25, 0.0  ;;  %v1039_v30 = vmax.f32 %v975_v26, 0.0  ;;  %v873_v31 = vmul.f32 %v2018_v15, %v691_v27  ;;  %v905_v32 = vmul.f32 %v2018_v15, %v819_v28 }
 0x157   :  { %v693_v33 = vpop.f32.mrf.mxu0  ;;  %v821_v34 = vpop.f32.mrf.mxu1 }
 0x158   :  { %v1568_v35 = vpack.c.bf16 %v1007_v29, %v1007_v29  ;;  %v1600_v36 = vpack.c.bf16 %v1039_v30, %v1039_v30  ;;  %v944_v37 = vadd.f32 %v2023_v17, %v873_v31  ;;  %v976_v38 = vadd.f32 %v2023_v17, %v905_v32 }
 0x159   :  { %v696_v39 = vpop.f32.mrf.mxu0  ;;  %v824_v40 = vpop.f32.mrf.mxu1 }
 0x15a   :  { %1328 = vst.msk [vmem:[%s2413_s4 + $0x68] sm:$0xf] %vm1301_vm3, %v1568_v35  ;;  %1360 = vst.msk [vmem:[%s2413_s4 + $0xe8] sm:$0xf] %vm1301_vm3, %v1600_v36  ;;  %v1008_v41 = vmax.f32 %v944_v37, 0.0  ;;  %v1040_v42 = vmax.f32 %v976_v38, 0.0  ;;  %v874_v43 = vmul.f32 %v2018_v15, %v696_v39  ;;  %v906_v44 = vmul.f32 %v2018_v15, %v824_v40 }
 0x15b   :  { %v698_v45 = vpop.f32.mrf.mxu0  ;;  %v826_v46 = vpop.f32.mrf.mxu1 }
 0x15c   :  { %v1569_v47 = vpack.c.bf16 %v1008_v41, %v1008_v41  ;;  %v1601_v48 = vpack.c.bf16 %v1040_v42, %v1040_v42  ;;  %v945_v49 = vadd.f32 %v2023_v17, %v874_v43  ;;  %v977_v50 = vadd.f32 %v2023_v17, %v906_v44 }
 0x15d   :  { %v699_v51 = vpop.f32.mrf.mxu0  ;;  %v827_v52 = vpop.f32.mrf.mxu1 }
 0x15e   :  { %1329 = vst.msk [vmem:[%s2413_s4 + $0x6c] sm:$0xf] %vm1301_vm3, %v1569_v47  ;;  %1361 = vst.msk [vmem:[%s2413_s4 + $0xec] sm:$0xf] %vm1301_vm3, %v1601_v48  ;;  %v1009_v53 = vmax.f32 %v945_v49, 0.0  ;;  %v1041_v54 = vmax.f32 %v977_v50, 0.0  ;;  %v875_v55 = vmul.f32 %v2018_v15, %v699_v51  ;;  %v907_v56 = vmul.f32 %v2018_v15, %v827_v52 }
 0x15f   :  { %v701_v57 = vpop.f32.mrf.mxu0  ;;  %v829_v58 = vpop.f32.mrf.mxu1 }
 0x160   :  { %v1570_v59 = vpack.c.bf16 %v1009_v53, %v1009_v53  ;;  %v1602_v60 = vpack.c.bf16 %v1041_v54, %v1041_v54  ;;  %v946_v61 = vadd.f32 %v2023_v17, %v875_v55  ;;  %v978_v62 = vadd.f32 %v2023_v17, %v907_v56 }
 0x161   :  { %v704_v63 = vpop.f32.mrf.mxu0  ;;  %v832_v0 = vpop.f32.mrf.mxu1 }
 0x162   :  { %1330 = vst.msk [vmem:[%s2413_s4 + $0x70] sm:$0xf] %vm1301_vm3, %v1570_v59  ;;  %1362 = vst.msk [vmem:[%s2413_s4 + $0xf0] sm:$0xf] %vm1301_vm3, %v1602_v60  ;;  %v1010_v1 = vmax.f32 %v946_v61, 0.0  ;;  %v1042_v2 = vmax.f32 %v978_v62, 0.0  ;;  %v876_v3 = vmul.f32 %v2018_v15, %v704_v63  ;;  %v908_v4 = vmul.f32 %v2018_v15, %v832_v0 }
 0x163   :  { %v706_v5 = vpop.f32.mrf.mxu0  ;;  %v834_v6 = vpop.f32.mrf.mxu1 }
 0x164   :  { %v1571_v7 = vpack.c.bf16 %v1010_v1, %v1010_v1  ;;  %v1603_v8 = vpack.c.bf16 %v1042_v2, %v1042_v2  ;;  %v947_v9 = vadd.f32 %v2023_v17, %v876_v3  ;;  %v979_v10 = vadd.f32 %v2023_v17, %v908_v4 }
 0x165   :  { %v707_v11 = vpop.f32.mrf.mxu0  ;;  %v835_v12 = vpop.f32.mrf.mxu1 }
 0x166   :  { %1331 = vst.msk [vmem:[%s2413_s4 + $0x74] sm:$0xf] %vm1301_vm3, %v1571_v7  ;;  %1363 = vst.msk [vmem:[%s2413_s4 + $0xf4] sm:$0xf] %vm1301_vm3, %v1603_v8  ;;  %v1011_v13 = vmax.f32 %v947_v9, 0.0  ;;  %v1043_v14 = vmax.f32 %v979_v10, 0.0  ;;  %v877_v16 = vmul.f32 %v2018_v15, %v707_v11  ;;  %v909_v18 = vmul.f32 %v2018_v15, %v835_v12 }
 0x167   :  { %v709_v19 = vpop.f32.mrf.mxu0  ;;  %v837_v20 = vpop.f32.mrf.mxu1 }
 0x168   :  { %v1572_v21 = vpack.c.bf16 %v1011_v13, %v1011_v13  ;;  %v1604_v22 = vpack.c.bf16 %v1043_v14, %v1043_v14  ;;  %v948_v23 = vadd.f32 %v2023_v17, %v877_v16  ;;  %v980_v24 = vadd.f32 %v2023_v17, %v909_v18 }
 0x16a   :  { %1332 = vst.msk [vmem:[%s2413_s4 + $0x78] sm:$0xf] %vm1301_vm3, %v1572_v21  ;;  %1364 = vst.msk [vmem:[%s2413_s4 + $0xf8] sm:$0xf] %vm1301_vm3, %v1604_v22  ;;  %v1012_v25 = vmax.f32 %v948_v23, 0.0  ;;  %v1044_v15 = vmax.f32 %v980_v24, 0.0 }
 0x16c   :  { %v1573_v26 = vpack.c.bf16 %v1012_v25, %v1012_v25  ;;  %v1605_v27 = vpack.c.bf16 %v1044_v15, %v1044_v15 }
 0x16e   :  { %1333 = vst.msk [vmem:[%s2413_s4 + $0x7c] sm:$0xf] %vm1301_vm3, %v1573_v26  ;;  %1365 = vst.msk [vmem:[%s2413_s4 + $0xfc] sm:$0xf] %vm1301_vm3, %v1605_v27 }

</bundles_post_ra>
